<compile_context>
chip_gen: v7x
topology: tpu7x:2x2x1
jax: 0.10.0
libtpu: 0.0.40
codegen_flags: <defaults>
</compile_context>

<pallas_src>
import jax
import jax.numpy as jnp
from jax.experimental import pallas as pl
from jax.experimental.pallas import tpu as pltpu

N_SAMPLES = 50   # number of reparameterization samples for the uncertainty map
CHUNK = 16       # samples per accumulation step (16-aligned sublane offsets)
_LANE = 128      # TPU lane width
_HIGHEST = jax.lax.Precision.HIGHEST


def _mm(a, b):
    return jnp.dot(a, b, preferred_element_type=jnp.float32, precision=_HIGHEST)


# --------------------------------------------------------------------------- kernels
def _pass1_kernel(x_ref, eps_var_ref, eps_px_ref, w_proj_ref, shift_ref, w_ms_ref,
                  unc_ref, probx_ref):
    """Per (batch, pixel-tile): mean/std heads, prob_x, 50-sample sigmoid variance."""
    x = x_ref[0]                                                   # (Cin, TILE_P)

    # input_proj: 1x1 conv with folded eval BatchNorm, then ReLU (Dropout2d = identity).
    h = jnp.maximum(_mm(w_proj_ref[...], x) + shift_ref[...], 0.0)  # (hidden, TILE_P)

    # Fused mean / log-variance heads: (2, hidden) @ (hidden, TILE_P).
    ms = _mm(w_ms_ref[...], h)
    mean = ms[0:1, :]                                              # (1, TILE_P)
    std = jnp.exp(0.5 * ms[1:2, :])                                # (1, TILE_P)

    # prob_x = reparameterize(mean, std, iter=1)
    probx_ref[0] = eps_px_ref[0].astype(jnp.float32) * std + mean

    # Unbiased variance (/49) over 50 sigmoid(reparameterized) samples, accumulated
    # chunk-by-chunk in shifted form (sigmoid(z) - 0.5 = 0.5*tanh(z/2)) so only a
    # handful of vregs are live at any time (no 50xTILE_P block, no spills) and the
    # single-pass sum/sumsq formula does not suffer cancellation.
    acc_s = jnp.zeros_like(mean)
    acc_q = jnp.zeros_like(mean)
    for c0 in range(0, N_SAMPLES, CHUNK):                          # static trip count
        n = min(CHUNK, N_SAMPLES - c0)
        eps = eps_var_ref[0, c0:c0 + n, :].astype(jnp.float32)     # (n, TILE_P)
        t = 0.5 * jnp.tanh(0.5 * (eps * std + mean))               # sigmoid(z) - 0.5
        acc_s = acc_s + jnp.sum(t, axis=0, keepdims=True)
        acc_q = acc_q + jnp.sum(t * t, axis=0, keepdims=True)
    m = acc_s * (1.0 / N_SAMPLES)
    var = (acc_q - N_SAMPLES * m * m) * (1.0 / (N_SAMPLES - 1))
    unc_ref[0] = jnp.maximum(var, 0.0)


def _pass2_kernel(stats_ref, x_ref, unc_ref, w_proj_ref, shift_ref,
                  w_conv_ref, b_conv_ref, res_ref):
    """Per (batch, pixel-tile): residual = conv(input_proj(x)) * (1 - normalized unc)."""
    x = x_ref[0]                                                   # (Cin, TILE_P)
    h = jnp.maximum(_mm(w_proj_ref[...], x) + shift_ref[...], 0.0)  # (hidden, TILE_P)
    res = _mm(w_conv_ref[...], h) + b_conv_ref[...]
    u_norm = (unc_ref[0] - stats_ref[0]) * stats_ref[1]            # (1, TILE_P)
    res_ref[0] = (res * (1.0 - u_norm)).astype(res_ref.dtype)


# --------------------------------------------------------------------------- wrapper
def _tile_and_pad(hw, cap=512):
    """Pick a lane-dense pixel tile (multiple of 128, <= cap) and pad HW up to it."""
    hwp128 = ((hw + _LANE - 1) // _LANE) * _LANE
    tile = min(cap, hwp128)
    hwp = ((hw + tile - 1) // tile) * tile
    return tile, hwp


def _sample_eps(key, batch, hwp):
    """Standard-normal samples (bf16 to halve HBM traffic; kernel upcasts to f32)."""
    k_var, k_px = jax.random.split(key)
    eps_var = jax.random.normal(k_var, (batch, N_SAMPLES, hwp), dtype=jnp.bfloat16)
    eps_px = jax.random.normal(k_px, (batch, 1, hwp), dtype=jnp.bfloat16)
    return eps_var, eps_px


def get_uncertainty_forward(x_nchw, params, key):
    """x_nchw: (B, Cin, H, W) f32. Returns (residual (B, hidden, H, W), prob_x (B, 1, H, W))."""
    B, Cin, H, W = x_nchw.shape
    hidden = params["w_conv"].shape[0]
    HW = H * W
    TILE_P, HWp = _tile_and_pad(HW)
    T = HWp // TILE_P

    # NCHW is already (batch, channels, pixels): pixels land on lanes, no transpose.
    x = x_nchw.reshape(B, Cin, HW).astype(jnp.float32)
    if HWp != HW:
        x = jnp.pad(x, ((0, 0), (0, 0), (0, HWp - HW)))

    # Fold eval-mode BatchNorm into the 1x1 projection weights.
    bn_scale = params["bn_gamma"] / jnp.sqrt(params["bn_var"] + 1e-5)          # (hidden,)
    w_projf = (params["w_proj"].reshape(hidden, Cin) * bn_scale[:, None]).astype(jnp.float32)
    bn_shift = (params["bn_beta"] - params["bn_mean"] * bn_scale).reshape(hidden, 1).astype(jnp.float32)

    # Fused mean / log-variance heads and the residual conv.
    w_ms = jnp.concatenate([params["w_mean"].reshape(1, hidden),
                            params["w_std"].reshape(1, hidden)], axis=0).astype(jnp.float32)
    w_conv = params["w_conv"].reshape(hidden, hidden).astype(jnp.float32)
    b_conv = params["b_conv"].reshape(hidden, 1).astype(jnp.float32)

    eps_var, eps_px = _sample_eps(key, B, HWp)

    weight_spec = lambda shape: pl.BlockSpec(shape, lambda b, t: (0, 0))
    pix_spec = lambda c: pl.BlockSpec((1, c, TILE_P), lambda b, t: (b, 0, t))
    smem_spec = pl.BlockSpec(memory_space=pltpu.MemorySpace.SMEM)
    parallel2 = pltpu.CompilerParams(dimension_semantics=("parallel", "parallel"))

    # ---- pass 1: per-pixel unnormalized uncertainty + prob_x ----
    unc, prob_x = pl.pallas_call(
        _pass1_kernel,
        grid=(B, T),
        in_specs=[pix_spec(Cin),
                  pix_spec(N_SAMPLES),
                  pix_spec(1),
                  weight_spec((hidden, Cin)),
                  weight_spec((hidden, 1)),
                  weight_spec((2, hidden))],
        out_specs=[pix_spec(1), pix_spec(1)],
        out_shape=[jax.ShapeDtypeStruct((B, 1, HWp), jnp.float32),
                   jax.ShapeDtypeStruct((B, 1, HWp), jnp.float32)],
        compiler_params=parallel2,
    )(x, eps_var, eps_px, w_projf, bn_shift, w_ms)

    # ---- global min/max normalization constants (tiny XLA reduce; ignores padding) ----
    u_valid = unc[:, :, :HW]
    u_min = jnp.min(u_valid)
    u_rng = jnp.max(u_valid) - u_min
    # Guard the degenerate constant-map case (PyTorch would produce NaN here).
    inv = jnp.where(u_rng > 0, 1.0 / u_rng, 0.0)
    stats = jnp.stack([u_min, inv]).astype(jnp.float32)                        # (2,)

    # ---- pass 2: residual = conv(input_proj(x)) * (1 - normalized uncertainty) ----
    residual = pl.pallas_call(
        _pass2_kernel,
        grid=(B, T),
        in_specs=[smem_spec,
                  pix_spec(Cin),
                  pix_spec(1),
                  weight_spec((hidden, Cin)),
                  weight_spec((hidden, 1)),
                  weight_spec((hidden, hidden)),
                  weight_spec((hidden, 1))],
        out_specs=pix_spec(hidden),
        out_shape=jax.ShapeDtypeStruct((B, hidden, HWp), jnp.float32),
        compiler_params=parallel2,
    )(stats, x, unc, w_projf, bn_shift, w_conv, b_conv)

    residual = residual[:, :, :HW].reshape(B, hidden, H, W)
    prob_x = prob_x[:, :, :HW].reshape(B, 1, H, W)
    return residual, prob_x


# --------------------------------------------------------------------------- params / demo
def init_params(key, input_dim, hidden_dim):
    ks = jax.random.split(key, 5)
    return {
        # input_proj[0]: Conv2d(input_dim, hidden_dim, 1, bias=False)
        "w_proj": 0.1 * jax.random.normal(ks[0], (hidden_dim, input_dim, 1, 1), jnp.float32),
        # input_proj[1]: BatchNorm2d(hidden_dim) default init + running stats
        "bn_gamma": jnp.ones((hidden_dim,), jnp.float32),
        "bn_beta": jnp.zeros((hidden_dim,), jnp.float32),
        "bn_mean": jnp.zeros((hidden_dim,), jnp.float32),
        "bn_var": jnp.ones((hidden_dim,), jnp.float32),
        # conv: Conv2d(hidden_dim, hidden_dim, 1) with bias
        "w_conv": 0.1 * jax.random.normal(ks[1], (hidden_dim, hidden_dim, 1, 1), jnp.float32),
        "b_conv": 0.01 * jax.random.normal(ks[2], (hidden_dim,), jnp.float32),
        # mean_conv / std_conv: Conv2d(hidden_dim, 1, 1, bias=False)
        "w_mean": 0.1 * jax.random.normal(ks[3], (1, hidden_dim, 1, 1), jnp.float32),
        "w_std": 0.1 * jax.random.normal(ks[4], (1, hidden_dim, 1, 1), jnp.float32),
    }


if __name__ == "__main__":
    B, Cin, H, W = 2, 4, 16, 16
    hidden = 32

    key = jax.random.PRNGKey(0)
    k_x, k_p, k_eps = jax.random.split(key, 3)

    x = jax.random.normal(k_x, (B, Cin, H, W), dtype=jnp.float32)
    params = init_params(k_p, Cin, hidden)

    residual, prob_x = get_uncertainty_forward(x, params, k_eps)
    jax.block_until_ready((residual, prob_x))

    assert residual.shape == (B, hidden, H, W)
    assert prob_x.shape == (B, 1, H, W)
    assert bool(jnp.isfinite(residual).all()) and bool(jnp.isfinite(prob_x).all())

    # Full numerical reference (possible because eps is reproducible from the key).
    HW = H * W
    _, HWp = _tile_and_pad(HW)
    eps_var_r, eps_px_r = _sample_eps(k_eps, B, HWp)
    eps_var_r = eps_var_r.astype(jnp.float32)[:, :, :HW]
    eps_px_r = eps_px_r.astype(jnp.float32)[:, :, :HW]

    bn_scale_r = params["bn_gamma"] / jnp.sqrt(params["bn_var"] + 1e-5)
    bn_shift_r = params["bn_beta"] - params["bn_mean"] * bn_scale_r
    xf = x.reshape(B, Cin, HW)
    h_ref = jnp.maximum(
        jnp.einsum("oc,bcp->bop", params["w_proj"].reshape(hidden, Cin), xf,
                   precision=_HIGHEST) * bn_scale_r[None, :, None]
        + bn_shift_r[None, :, None], 0.0)
    conv_ref = (jnp.einsum("oc,bcp->bop", params["w_conv"].reshape(hidden, hidden),
                           h_ref, precision=_HIGHEST)
                + params["b_conv"][None, :, None])
    mean_ref = jnp.einsum("oc,bcp->bop", params["w_mean"].reshape(1, hidden),
                          h_ref, precision=_HIGHEST)
    std_ref = jnp.exp(0.5 * jnp.einsum("oc,bcp->bop", params["w_std"].reshape(1, hidden),
                                       h_ref, precision=_HIGHEST))

    s_ref = jax.nn.sigmoid(eps_var_r * std_ref + mean_ref)
    var_ref = jnp.var(s_ref, axis=1, ddof=1, keepdims=True)
    u_ref = (var_ref - var_ref.min()) / (var_ref.max() - var_ref.min())
    res_ref = (conv_ref * (1.0 - u_ref)).reshape(B, hidden, H, W)
    px_ref = (eps_px_r * std_ref + mean_ref).reshape(B, 1, H, W)

    assert bool(jnp.allclose(prob_x, px_ref, atol=2e-3, rtol=2e-3))
    assert bool(jnp.allclose(residual, res_ref, atol=2e-3, rtol=2e-3))

    print("KERNEL_OK")
</pallas_src>

<mosaic_0001>
module attributes {stable_mosaic.version = 11 : i64} {
  func.func @_pass1_kernel(%arg0: i32, %arg1: i32, %arg2: memref<1x4x256xf32, #tpu.memory_space<vmem>>, %arg3: memref<1x50x256xbf16, #tpu.memory_space<vmem>>, %arg4: memref<1x1x256xbf16, #tpu.memory_space<vmem>>, %arg5: memref<32x4xf32, #tpu.memory_space<vmem>>, %arg6: memref<32x1xf32, #tpu.memory_space<vmem>>, %arg7: memref<2x32xf32, #tpu.memory_space<vmem>>, %arg8: memref<1x1x256xf32, #tpu.memory_space<vmem>>, %arg9: memref<1x1x256xf32, #tpu.memory_space<vmem>>) attributes {dimension_semantics = [#tpu.dimension_semantics<parallel>, #tpu.dimension_semantics<parallel>], iteration_bounds = array<i64: 2, 1>, scalar_prefetch = 0 : i64, scratch_operands = 0 : i64, tpu.core_type = #tpu.core_type<tc>, window_params = [{transform_indices = @transform_0, window_bounds = array<i64: 1, 4, 256>}, {transform_indices = @transform_1, window_bounds = array<i64: 1, 50, 256>}, {transform_indices = @transform_2, window_bounds = array<i64: 1, 1, 256>}, {pipeline_mode = #tpu.pipeline_mode<synchronous>, transform_indices = @transform_3, window_bounds = array<i64: 32, 4>}, {pipeline_mode = #tpu.pipeline_mode<synchronous>, transform_indices = @transform_4, window_bounds = array<i64: 32, 1>}, {pipeline_mode = #tpu.pipeline_mode<synchronous>, transform_indices = @transform_5, window_bounds = array<i64: 2, 32>}, {transform_indices = @transform_6, window_bounds = array<i64: 1, 1, 256>}, {transform_indices = @transform_7, window_bounds = array<i64: 1, 1, 256>}]} {
    %c0 = arith.constant 0 : index
    %c0_0 = arith.constant 0 : index
    %c0_1 = arith.constant 0 : index
    %0 = vector.load %arg2[%c0, %c0_0, %c0_1] : memref<1x4x256xf32, #tpu.memory_space<vmem>>, vector<1x4x256xf32>
    %1 = vector.shape_cast %0 : vector<1x4x256xf32> to vector<4x256xf32>
    %c0_2 = arith.constant 0 : index
    %c0_3 = arith.constant 0 : index
    %2 = vector.load %arg5[%c0_2, %c0_3] : memref<32x4xf32, #tpu.memory_space<vmem>>, vector<32x4xf32>
    %cst = arith.constant dense<0.000000e+00> : vector<32x256xf32>
    %3 = tpu.matmul %2, %1, %cst {dimension_numbers = #tpu.dot_dimension_numbers<[1], [0], [0], [1], [0, 0, 1, 1], [], []>, precision = #tpu.contract_precision<fp32>} : vector<32x4xf32>, vector<4x256xf32>, vector<32x256xf32> -> vector<32x256xf32>
    %c0_4 = arith.constant 0 : index
    %c0_5 = arith.constant 0 : index
    %4 = vector.load %arg6[%c0_4, %c0_5] : memref<32x1xf32, #tpu.memory_space<vmem>>, vector<32x1xf32>
    %5 = vector.broadcast %4 : vector<32x1xf32> to vector<32x256xf32>
    %6 = arith.addf %3, %5 : vector<32x256xf32>
    %cst_6 = arith.constant 0.000000e+00 : f32
    %7 = vector.broadcast %cst_6 : f32 to vector<32x256xf32>
    %8 = arith.maximumf %6, %7 : vector<32x256xf32>
    %c0_7 = arith.constant 0 : index
    %c0_8 = arith.constant 0 : index
    %9 = vector.load %arg7[%c0_7, %c0_8] : memref<2x32xf32, #tpu.memory_space<vmem>>, vector<2x32xf32>
    %cst_9 = arith.constant dense<0.000000e+00> : vector<2x256xf32>
    %10 = tpu.matmul %9, %8, %cst_9 {dimension_numbers = #tpu.dot_dimension_numbers<[1], [0], [0], [1], [0, 0, 1, 1], [], []>, precision = #tpu.contract_precision<fp32>} : vector<2x32xf32>, vector<32x256xf32>, vector<2x256xf32> -> vector<2x256xf32>
    %11 = vector.extract_strided_slice %10 {offsets = [0, 0], sizes = [1, 256], strides = [1, 1]} : vector<2x256xf32> to vector<1x256xf32>
    %12 = vector.extract_strided_slice %10 {offsets = [1, 0], sizes = [1, 256], strides = [1, 1]} : vector<2x256xf32> to vector<1x256xf32>
    %cst_10 = arith.constant 5.000000e-01 : f32
    %13 = vector.broadcast %cst_10 : f32 to vector<1x256xf32>
    %14 = arith.mulf %13, %12 : vector<1x256xf32>
    %15 = math.exp %14 : vector<1x256xf32>
    %c0_11 = arith.constant 0 : index
    %c0_12 = arith.constant 0 : index
    %c0_13 = arith.constant 0 : index
    %16 = vector.load %arg4[%c0_11, %c0_12, %c0_13] : memref<1x1x256xbf16, #tpu.memory_space<vmem>>, vector<1x1x256xbf16>
    %17 = vector.shape_cast %16 : vector<1x1x256xbf16> to vector<1x256xbf16>
    %18 = arith.extf %17 : vector<1x256xbf16> to vector<1x256xf32>
    %19 = arith.mulf %18, %15 : vector<1x256xf32>
    %20 = arith.addf %19, %11 : vector<1x256xf32>
    %c0_14 = arith.constant 0 : index
    %c0_15 = arith.constant 0 : index
    %c0_16 = arith.constant 0 : index
    %21 = vector.load %arg9[%c0_14, %c0_15, %c0_16] : memref<1x1x256xf32, #tpu.memory_space<vmem>>, vector<1x1x256xf32>
    %22 = vector.shape_cast %21 : vector<1x1x256xf32> to vector<1x256xf32>
    %23 = vector.shape_cast %20 : vector<1x256xf32> to vector<1x1x256xf32>
    tpu.vector_store %arg9[%c0_14, %c0_15, %c0_16], %23 {strides = array<i32>} : memref<1x1x256xf32, #tpu.memory_space<vmem>>, vector<1x1x256xf32>,
    %cst_17 = arith.constant 0.000000e+00 : f32
    %24 = vector.broadcast %cst_17 : f32 to vector<1x256xf32>
    %cst_18 = arith.constant 0.000000e+00 : f32
    %25 = vector.broadcast %cst_18 : f32 to vector<1x256xf32>
    %c0_19 = arith.constant 0 : index
    %c0_20 = arith.constant 0 : index
    %c0_21 = arith.constant 0 : index
    %26 = vector.load %arg3[%c0_19, %c0_20, %c0_21] : memref<1x50x256xbf16, #tpu.memory_space<vmem>>, vector<1x16x256xbf16>
    %27 = vector.shape_cast %26 : vector<1x16x256xbf16> to vector<16x256xbf16>
    %28 = arith.extf %27 : vector<16x256xbf16> to vector<16x256xf32>
    %29 = vector.broadcast %15 : vector<1x256xf32> to vector<16x256xf32>
    %30 = arith.mulf %28, %29 : vector<16x256xf32>
    %31 = vector.broadcast %11 : vector<1x256xf32> to vector<16x256xf32>
    %32 = arith.addf %30, %31 : vector<16x256xf32>
    %cst_22 = arith.constant 5.000000e-01 : f32
    %33 = vector.broadcast %cst_22 : f32 to vector<16x256xf32>
    %34 = arith.mulf %33, %32 : vector<16x256xf32>
    %35 = math.tanh %34 : vector<16x256xf32>
    %cst_23 = arith.constant 5.000000e-01 : f32
    %36 = vector.broadcast %cst_23 : f32 to vector<16x256xf32>
    %37 = arith.mulf %36, %35 : vector<16x256xf32>
    %cst_24 = arith.constant dense<0.000000e+00> : vector<256xf32>
    %38 = vector.multi_reduction <add>, %37, %cst_24 [0] : vector<16x256xf32> to vector<256xf32>
    %39 = vector.shape_cast %38 : vector<256xf32> to vector<1x256xf32>
    %40 = arith.addf %24, %39 : vector<1x256xf32>
    %41 = arith.mulf %37, %37 : vector<16x256xf32>
    %cst_25 = arith.constant dense<0.000000e+00> : vector<256xf32>
    %42 = vector.multi_reduction <add>, %41, %cst_25 [0] : vector<16x256xf32> to vector<256xf32>
    %43 = vector.shape_cast %42 : vector<256xf32> to vector<1x256xf32>
    %44 = arith.addf %25, %43 : vector<1x256xf32>
    %c0_26 = arith.constant 0 : index
    %c16 = arith.constant 16 : index
    %c0_27 = arith.constant 0 : index
    %45 = vector.load %arg3[%c0_26, %c16, %c0_27] : memref<1x50x256xbf16, #tpu.memory_space<vmem>>, vector<1x16x256xbf16>
    %46 = vector.shape_cast %45 : vector<1x16x256xbf16> to vector<16x256xbf16>
    %47 = arith.extf %46 : vector<16x256xbf16> to vector<16x256xf32>
    %48 = vector.broadcast %15 : vector<1x256xf32> to vector<16x256xf32>
    %49 = arith.mulf %47, %48 : vector<16x256xf32>
    %50 = vector.broadcast %11 : vector<1x256xf32> to vector<16x256xf32>
    %51 = arith.addf %49, %50 : vector<16x256xf32>
    %cst_28 = arith.constant 5.000000e-01 : f32
    %52 = vector.broadcast %cst_28 : f32 to vector<16x256xf32>
    %53 = arith.mulf %52, %51 : vector<16x256xf32>
    %54 = math.tanh %53 : vector<16x256xf32>
    %cst_29 = arith.constant 5.000000e-01 : f32
    %55 = vector.broadcast %cst_29 : f32 to vector<16x256xf32>
    %56 = arith.mulf %55, %54 : vector<16x256xf32>
    %cst_30 = arith.constant dense<0.000000e+00> : vector<256xf32>
    %57 = vector.multi_reduction <add>, %56, %cst_30 [0] : vector<16x256xf32> to vector<256xf32>
    %58 = vector.shape_cast %57 : vector<256xf32> to vector<1x256xf32>
    %59 = arith.addf %40, %58 : vector<1x256xf32>
    %60 = arith.mulf %56, %56 : vector<16x256xf32>
    %cst_31 = arith.constant dense<0.000000e+00> : vector<256xf32>
    %61 = vector.multi_reduction <add>, %60, %cst_31 [0] : vector<16x256xf32> to vector<256xf32>
    %62 = vector.shape_cast %61 : vector<256xf32> to vector<1x256xf32>
    %63 = arith.addf %44, %62 : vector<1x256xf32>
    %c0_32 = arith.constant 0 : index
    %c32 = arith.constant 32 : index
    %c0_33 = arith.constant 0 : index
    %64 = vector.load %arg3[%c0_32, %c32, %c0_33] : memref<1x50x256xbf16, #tpu.memory_space<vmem>>, vector<1x16x256xbf16>
    %65 = vector.shape_cast %64 : vector<1x16x256xbf16> to vector<16x256xbf16>
    %66 = arith.extf %65 : vector<16x256xbf16> to vector<16x256xf32>
    %67 = vector.broadcast %15 : vector<1x256xf32> to vector<16x256xf32>
    %68 = arith.mulf %66, %67 : vector<16x256xf32>
    %69 = vector.broadcast %11 : vector<1x256xf32> to vector<16x256xf32>
    %70 = arith.addf %68, %69 : vector<16x256xf32>
    %cst_34 = arith.constant 5.000000e-01 : f32
    %71 = vector.broadcast %cst_34 : f32 to vector<16x256xf32>
    %72 = arith.mulf %71, %70 : vector<16x256xf32>
    %73 = math.tanh %72 : vector<16x256xf32>
    %cst_35 = arith.constant 5.000000e-01 : f32
    %74 = vector.broadcast %cst_35 : f32 to vector<16x256xf32>
    %75 = arith.mulf %74, %73 : vector<16x256xf32>
    %cst_36 = arith.constant dense<0.000000e+00> : vector<256xf32>
    %76 = vector.multi_reduction <add>, %75, %cst_36 [0] : vector<16x256xf32> to vector<256xf32>
    %77 = vector.shape_cast %76 : vector<256xf32> to vector<1x256xf32>
    %78 = arith.addf %59, %77 : vector<1x256xf32>
    %79 = arith.mulf %75, %75 : vector<16x256xf32>
    %cst_37 = arith.constant dense<0.000000e+00> : vector<256xf32>
    %80 = vector.multi_reduction <add>, %79, %cst_37 [0] : vector<16x256xf32> to vector<256xf32>
    %81 = vector.shape_cast %80 : vector<256xf32> to vector<1x256xf32>
    %82 = arith.addf %63, %81 : vector<1x256xf32>
    %c0_38 = arith.constant 0 : index
    %c48 = arith.constant 48 : index
    %c0_39 = arith.constant 0 : index
    %83 = vector.load %arg3[%c0_38, %c48, %c0_39] : memref<1x50x256xbf16, #tpu.memory_space<vmem>>, vector<1x2x256xbf16>
    %84 = vector.shape_cast %83 : vector<1x2x256xbf16> to vector<2x256xbf16>
    %85 = arith.extf %84 : vector<2x256xbf16> to vector<2x256xf32>
    %86 = vector.broadcast %15 : vector<1x256xf32> to vector<2x256xf32>
    %87 = arith.mulf %85, %86 : vector<2x256xf32>
    %88 = vector.broadcast %11 : vector<1x256xf32> to vector<2x256xf32>
    %89 = arith.addf %87, %88 : vector<2x256xf32>
    %cst_40 = arith.constant 5.000000e-01 : f32
    %90 = vector.broadcast %cst_40 : f32 to vector<2x256xf32>
    %91 = arith.mulf %90, %89 : vector<2x256xf32>
    %92 = math.tanh %91 : vector<2x256xf32>
    %cst_41 = arith.constant 5.000000e-01 : f32
    %93 = vector.broadcast %cst_41 : f32 to vector<2x256xf32>
    %94 = arith.mulf %93, %92 : vector<2x256xf32>
    %cst_42 = arith.constant dense<0.000000e+00> : vector<256xf32>
    %95 = vector.multi_reduction <add>, %94, %cst_42 [0] : vector<2x256xf32> to vector<256xf32>
    %96 = vector.shape_cast %95 : vector<256xf32> to vector<1x256xf32>
    %97 = arith.addf %78, %96 : vector<1x256xf32>
    %98 = arith.mulf %94, %94 : vector<2x256xf32>
    %cst_43 = arith.constant dense<0.000000e+00> : vector<256xf32>
    %99 = vector.multi_reduction <add>, %98, %cst_43 [0] : vector<2x256xf32> to vector<256xf32>
    %100 = vector.shape_cast %99 : vector<256xf32> to vector<1x256xf32>
    %101 = arith.addf %82, %100 : vector<1x256xf32>
    %cst_44 = arith.constant 2.000000e-02 : f32
    %102 = vector.broadcast %cst_44 : f32 to vector<1x256xf32>
    %103 = arith.mulf %97, %102 : vector<1x256xf32>
    %cst_45 = arith.constant 5.000000e+01 : f32
    %104 = vector.broadcast %cst_45 : f32 to vector<1x256xf32>
    %105 = arith.mulf %104, %103 : vector<1x256xf32>
    %106 = arith.mulf %105, %103 : vector<1x256xf32>
    %107 = arith.subf %101, %106 : vector<1x256xf32>
    %cst_46 = arith.constant 0.0204081628 : f32
    %108 = vector.broadcast %cst_46 : f32 to vector<1x256xf32>
    %109 = arith.mulf %107, %108 : vector<1x256xf32>
    %cst_47 = arith.constant 0.000000e+00 : f32
    %110 = vector.broadcast %cst_47 : f32 to vector<1x256xf32>
    %111 = arith.maximumf %109, %110 : vector<1x256xf32>
    %c0_48 = arith.constant 0 : index
    %c0_49 = arith.constant 0 : index
    %c0_50 = arith.constant 0 : index
    %112 = vector.load %arg8[%c0_48, %c0_49, %c0_50] : memref<1x1x256xf32, #tpu.memory_space<vmem>>, vector<1x1x256xf32>
    %113 = vector.shape_cast %112 : vector<1x1x256xf32> to vector<1x256xf32>
    %114 = vector.shape_cast %111 : vector<1x256xf32> to vector<1x1x256xf32>
    tpu.vector_store %arg8[%c0_48, %c0_49, %c0_50], %114 {strides = array<i32>} : memref<1x1x256xf32, #tpu.memory_space<vmem>>, vector<1x1x256xf32>,
    return
  }
  func.func @transform_0(%arg0: i32, %arg1: i32) -> (i32, i32, i32) {
    %c0_i32 = arith.constant 0 : i32
    %c0_i32_0 = arith.constant 0 : i32
    return %arg0, %c0_i32, %arg1 : i32, i32, i32
  }
  func.func @transform_1(%arg0: i32, %arg1: i32) -> (i32, i32, i32) {
    %c0_i32 = arith.constant 0 : i32
    %c0_i32_0 = arith.constant 0 : i32
    return %arg0, %c0_i32, %arg1 : i32, i32, i32
  }
  func.func @transform_2(%arg0: i32, %arg1: i32) -> (i32, i32, i32) {
    %c0_i32 = arith.constant 0 : i32
    %c0_i32_0 = arith.constant 0 : i32
    return %arg0, %c0_i32, %arg1 : i32, i32, i32
  }
  func.func @transform_3(%arg0: i32, %arg1: i32) -> (i32, i32) {
    %c0_i32 = arith.constant 0 : i32
    %c0_i32_0 = arith.constant 0 : i32
    %c0_i32_1 = arith.constant 0 : i32
    return %c0_i32, %c0_i32_0 : i32, i32
  }
  func.func @transform_4(%arg0: i32, %arg1: i32) -> (i32, i32) {
    %c0_i32 = arith.constant 0 : i32
    %c0_i32_0 = arith.constant 0 : i32
    %c0_i32_1 = arith.constant 0 : i32
    return %c0_i32, %c0_i32_0 : i32, i32
  }
  func.func @transform_5(%arg0: i32, %arg1: i32) -> (i32, i32) {
    %c0_i32 = arith.constant 0 : i32
    %c0_i32_0 = arith.constant 0 : i32
    %c0_i32_1 = arith.constant 0 : i32
    return %c0_i32, %c0_i32_0 : i32, i32
  }
  func.func @transform_6(%arg0: i32, %arg1: i32) -> (i32, i32, i32) {
    %c0_i32 = arith.constant 0 : i32
    %c0_i32_0 = arith.constant 0 : i32
    return %arg0, %c0_i32, %arg1 : i32, i32, i32
  }
  func.func @transform_7(%arg0: i32, %arg1: i32) -> (i32, i32, i32) {
    %c0_i32 = arith.constant 0 : i32
    %c0_i32_0 = arith.constant 0 : i32
    return %arg0, %c0_i32, %arg1 : i32, i32, i32
  }
}

</mosaic_0001>

<bundles_post_ra>
// kernel: tpu_custom_call.1
= control target key start
LH: loop header
LB: loop body
LE: loop exit
PB: predicated region body
PF: predicated region fallthrough
CT: control target
= control target key end

     0   :  { %13 = vsyncpa [#allocation3], 0  ;;  %s2904_s0 = inlined_call_operand.vmem [shape: f32[2,4,256], index: 0, kind: input, shape index: {}]   ;;  %s2905_s1 = inlined_call_operand.vmem [shape: bf16[2,50,256], index: 1, kind: input, shape index: {}]   ;;  %s2906_s2 = inlined_call_operand.vmem [shape: bf16[2,1,256], index: 2, kind: input, shape index: {}]   ;;  %s2907_s3 = inlined_call_operand.vmem [shape: f32[32,4], index: 3, kind: input, shape index: {}]   ;;  %s2908_s4 = inlined_call_operand.vmem [shape: f32[32,1], index: 4, kind: input, shape index: {}]   ;;  %s2909_s5 = inlined_call_operand.vmem [shape: f32[2,32], index: 5, kind: input, shape index: {}]   ;;  %s2910_s6 = inlined_call_operand.hbm [shape: f32[2,1,256], index: 6, kind: output, shape index: {0}]   ;;  %s2911_s7 = inlined_call_operand.hbm [shape: f32[2,1,256], index: 7, kind: output, shape index: {1}]  }
   0x1   :  { %15 = vsyncpa [#allocation3 + $0x1], 0 }
   0x2   :  { %16 = vsyncpa [#allocation5], 0 }
   0x3   :  { %18 = vsyncpa [#allocation5 + $0x1], 0  ;;  %s2508_s24 = smov 0   ;;  %s2510_s25 = smov 0  }
   0x4   :  { %s2512_s26 = smov 0   ;;  %s2514_s27 = smov 0  }
   0x5   :  { %s2516_s28 = smov 0   ;;  %s2518_s29 = smov 0  }
   0x6 LB: > { %s2119_s30 = sadd.s32 4294967295, %s2460_s29   ;;  %s2120_s8 = sadd.s32 4294967294, %s2460_s29   ;;  %s2460_s29 = sphi %s2518_s29, %s24_s29   ;;  %s2456_s28 = sphi %s2516_s28, %s2922_s28   ;;  %s2452_s27 = sphi %s2514_s27, %s2921_s27   ;;  %s2448_s26 = sphi %s2512_s26, %s2920_s26   ;;  %s2444_s25 = sphi %s2510_s25, %s2919_s25   ;;  %s2440_s24 = sphi %s2508_s24, %s2918_s24  }
   0x7   : > { %s36_s9 = sadd.s32 1, %s2456_s28  ;;  %s192_s10 = sadd.s32 1, %s2448_s26 }
   0x8   : > { %p38_p0 = scmp.ge.s32.totalorder %s36_s9, 2  ;;  %p202_p1 = scmp.ne.s32.totalorder %s2448_s26, %s2444_s25 }
   0x9   : > { %p203_p2 = scmp.eq.s32.totalorder %s2119_s30, 1  ;;  %p208_p3 = scmp.ne.s32.totalorder %s2444_s25, %s2440_s24 }
   0xa   : > { %s2924_s9 = smov (%p38_p0, %s36_s9), 0  ;;  %p209_p5 = scmp.eq.s32.totalorder %s2120_s8, 1 }
   0xb   : > { %p2548_p4 = por %p203_p2, %p202_p1  ;;  %s187_s12 = ssub.s32 %s2456_s28, %s2924_s9 }
   0xc   : > { %p2123_p6 = scmp.ge.s32.totalorder %s2460_s29, 1  ;;  %p190_p7 = scmp.eq.s32.totalorder %s187_s12, 0 }
   0xd   : > { %p2555_p8 = por %p209_p5, %p208_p3  ;;  %p302_p9 = scmp.lt.s32.totalorder %s2460_s29, 3 }
   0xe   : > { %s2561_s14 = scalar_select %p190_p7, %s2448_s26, %s192_s10  }
   0xf   : > { %p303_p10 = pnand %p2123_p6, %p302_p9 }
  0x10   : > { %p361_p11 = scmp.lt.s32.totalorder (!%p303_p10), %s2452_s27, 1  ;;  %v392_v0 = vld [vmem:[%s2907_s3] sm:$0xff] (!%p303_p10)  ;;  %vm422_vm0 = vcmask (!%p303_p10), 31744   ;;  %v393_v1 = vld [vmem:[%s2907_s3 + $0x8] sm:$0xff] (!%p303_p10)  ;;  %v2462_v2 = vmov (!%p303_p10), 0.0   ;;  %v394_v5 = vld [vmem:[%s2907_s3 + $0x10] sm:$0xff] (!%p303_p10) }
  0x11   : > { %306 = sbr.rel (%p303_p10) target bundleno = 706 (0x2c2), region = 44  ;;  %625 = vmatprep.mubr.f32.mxu0 (!%p303_p10), %v2462_v2  ;;  %v424_v3 = vsel (!%p303_p10), %vm422_vm0, %v392_v0, 0  ;;  %v427_v4 = vsel (!%p303_p10), %vm422_vm0, %v393_v1, 0  ;;  %506 = vmatprep.mubr.f32.mxu1 (!%p303_p10), %v2462_v2  ;;  %v396_v6 = vld [vmem:[%s2908_s4] sm:$0xff] (!%p303_p10)  ;;  %v430_v9 = vsel (!%p303_p10), %vm422_vm0, %v394_v5, 0  ;;  %v2463_v10 = vmov (!%p303_p10), 0  }
  0x12   : > { %v2583_v7 = vand.u32 (!%p303_p10), 4294901760, %v424_v3  ;;  %v2585_v8 = vand.u32 (!%p303_p10), 4294901760, %v427_v4  ;;  %2315 = vset.pattern.permute.xlu0 (!%p303_p10), %v2463_v10  ;;  %2316 = vset.pattern.permute.xlu1 (!%p303_p10), %v2463_v10  ;;  %v395_v11 = vld [vmem:[%s2907_s3 + $0x18] sm:$0xff] (!%p303_p10)  ;;  %v398_v12 = vld [vmem:[%s2908_s4 + $0x10] sm:$0xff] (!%p303_p10)  ;;  %vm435_vm1 = vcmask (!%p303_p10), 1043456   ;;  %v397_v15 = vld [vmem:[%s2908_s4 + $0x8] sm:$0xff] (!%p303_p10) }
  0x13   : > { %402 = vperm.xlu0 (!%p303_p10), %2315, %v396_v6   ;;  %412 = vperm.xlu1 (!%p303_p10), %2316, %v398_v12   ;;  %v2607_v16 = vand.u32 (!%p303_p10), 4294901760, %v430_v9  ;;  %v399_v17 = vld [vmem:[%s2908_s4 + $0x18] sm:$0xff] (!%p303_p10)  ;;  %v433_v19 = vsel (!%p303_p10), %vm422_vm0, %v395_v11, 0  ;;  %v1060_v56 = vld [vmem:[%s2909_s5] sm:$0x3] (!%p303_p10)  ;;  %vm1061_vm2 = vcmask (!%p303_p10), 261120  }
  0x14   : > { %v2596_v13 = vsub.f32 (!%p303_p10), %v424_v3, %v2583_v7  ;;  %v2599_v14 = vsub.f32 (!%p303_p10), %v427_v4, %v2585_v8  ;;  %v2623_v28 = vand.u32 (!%p303_p10), 4294901760, %v433_v19  ;;  %v1063_v57 = vsel (!%p303_p10), %vm1061_vm2, %v1060_v56, 0  ;;  %s2912_s22 = sshll.u32 (!%p303_p10), %s2452_s27, 5  ;;  %s2466_s18 = smov (!%p303_p10), [#allocation4]  }
  0x15   : > { %v530_v27 = vsub.f32 (!%p303_p10), %v430_v9, %v2607_v16  ;;  %v2677_v59 = vand.u32 (!%p303_p10), 4294901760, %v1063_v57  ;;  %s2354_s19 = sshll.u32 (!%p303_p10), %s2466_s18, 4  ;;  %s2355_s19 = int_to_ptr.vmem [resolvable:$false] %s2354_s19 }
  0x16   : > { %v509_v20 = vand.u32 (!%p303_p10), 4294901760, %v2596_v13  ;;  %v520_v21 = vand.u32 (!%p303_p10), 4294901760, %v2599_v14  ;;  %v541_v38 = vsub.f32 (!%p303_p10), %v433_v19, %v2623_v28 }
  0x17   : > { %407 = vperm.xlu0 (!%p303_p10), %2315, %v397_v15   ;;  %417 = vperm.xlu1 (!%p303_p10), %2316, %v399_v17   ;;  %v531_v35 = vand.u32 (!%p303_p10), 4294901760, %v530_v27  ;;  %v2680_v1 = vsub.f32 (!%p303_p10), %v1063_v57, %v2677_v59 }
  0x18   : > { %s2581_s23 = scalar_select %p361_p11, %s2452_s27, 1  ;;  %v510_v25 = vsub.f32 %v2596_v13, %v509_v20  ;;  %v521_v32 = vsub.f32 %v2599_v14, %v520_v21  ;;  %v542_v41 = vand.u32 4294901760, %v541_v38 }
  0x19   : > { %v532_v42 = vsub.f32 %v530_v27, %v531_v35  ;;  %v1140_v11 = vand.u32 4294901760, %v2680_v1 }
  0x1a   : > { %s2139_s15 = sshll.u32 %s2581_s23, 3  ;;  %v511_v31 = vand.u32 4294901760, %v510_v25  ;;  %v522_v39 = vand.u32 4294901760, %v521_v32  ;;  %v543_v46 = vsub.f32 %v541_v38, %v542_v41  ;;  %s2250_s10 = smul.u32 56, %s2581_s23 }
  0x1b   : > { %s368_s20 = scalar_lea.vmem %s2904_s0, %s2139_s15  ;;  %v533_v45 = vand.u32 4294901760, %v532_v42  ;;  %v2690_v25 = vsub.f32 %v2680_v1, %v1140_v11  ;;  %s2129_s17 = sshll.u32 %s2581_s23, 1 }
  0x1c   : > { %v391_v18 = vld [vmem:[%s368_s20] sm:$0xff]  ;;  %v544_v47 = vand.u32 4294901760, %v543_v46  ;;  %s378_s16 = scalar_lea.vmem %s2905_s1, %s2250_s10  ;;  %s387_s20 = scalar_lea.vmem %s2906_s2, %s2129_s17 }
  0x1d   : > { %v421_v22 = vcombine.high %v391_v18, %v391_v18  ;;  %v436_v23 = vsel %vm435_vm1, %v391_v18, 0  ;;  %s2767_s23 = sand.u32 1, %s2444_s25   ;;  %s2807_s15 = scalar_lea.hbm %s2911_s7, %s2912_s22 }
  0x1e   : > { %v2616_v24 = vand.u32 4294901760, %v436_v23  ;;  %s2124_s21 = sshll.u32 %s2767_s23, 1 }
  0x1f   : > { %v438_v26 = vsel %vm435_vm1, %v421_v22, 0  ;;  %s359_s30 = scalar_lea.vmem [#allocation4], %s2124_s21 }
  0x20   : > { %v440_v29 = vand.u32 4294901760, %v438_v26  ;;  %v558_v30 = vsub.f32 %v436_v23, %v2616_v24  ;;  %s1975_s8 = sshll.u32 %s359_s30, 4  ;;  %s2809_s8 = int_to_ptr.vmem [resolvable:$true] %s1975_s8 }
  0x21   : > { %s2350_s17 = scalar_lea.vmem %s2809_s8, 32  ;;  %p2357_p1 = scmp.lt.s32.totalorder %s2809_s8, %s2355_s19 }
  0x22   : > { %v552_v33 = vsub.f32 %v438_v26, %v440_v29  ;;  %v559_v34 = vand.u32 4294901760, %v558_v30  ;;  %441 = vmatprep.subr.mxu1 %v440_v29  ;;  %p2351_p12 = scmp.ne.s32.totalorder %s2809_s8, %s2350_s17 }
  0x23   : > { %443 = vmatpush1.msra.mxu1 %v2616_v24 }
  0x24   : > { %v553_v36 = vand.u32 4294901760, %v552_v33  ;;  %v560_v37 = vsub.f32 %v558_v30, %v559_v34  ;;  %512 = vmatmul.mubr.f32.vlgmr.msra.gmra.mrb[0].mxu1 %v511_v31  ;;  %p2352_p13 = pnand %p2351_p12, %p2548_p4 }
  0x25   : > { %517 = vmatprep.mubr.f32.mxu1 %v2462_v2 }
  0x26   : > { %v554_v40 = vsub.f32 %v552_v33, %v553_v36  ;;  %v561_v43 = vand.u32 4294901760, %v560_v37  ;;  %p2353_p0 = pneg %p2352_p13 }
  0x28   : > { %v555_v44 = vand.u32 4294901760, %v554_v40  ;;  %523 = vmatmul.mubr.f32.gmra.mrb[2].mxu1 %v522_v39 }
  0x29   : > { %528 = vmatprep.mubr.f32.mxu1 %v2462_v2 }
  0x2a   : > { %556 = vmatprep.subr.mxu0 %v555_v44  ;;  %2190 = vmatprep.subr.mxu1 %v555_v44 }
  0x2b   : > { %562 = vmatpush1.msra.mxu0 %v561_v43  ;;  %2191 = vmatpush1.msra.mxu1 %v561_v43 }
  0x2c   : > { %627 = vmatmul.mubr.f32.vlgmr.msra.gmra.mrb[0].mxu0 %v2583_v7  ;;  %656 = vmatprep.subr.mxu0 %v552_v33 }
  0x2d   : > { %659 = vmatpush1.msra.mxu0 %v558_v30  ;;  %722 = vmatprep.mubr.f32.mxu0 %v2462_v2 }
  0x2e   : > { %756 = vmatprep.subr.mxu0 %v440_v29  ;;  %534 = vmatmul.mubr.f32.gmra.mrb[4].mxu1 %v533_v45 }
  0x2f   : > { %539 = vmatprep.mubr.f32.mxu1 %v2462_v2 }
  0x32   : > { %545 = vmatmul.mubr.f32.gmra.mrb[6].mxu1 %v544_v47 }
  0x33   : > { %632 = vmatprep.mubr.f32.mxu1 %v2462_v2 }
  0x34   : > { %725 = vmatmul.mubr.f32.vlgmr.msra.gmra.mrb[0].mxu0 %v2596_v13 }
  0x35   : > { %730 = vmatprep.mubr.f32.mxu0 %v2462_v2  ;;  %758 = vmatpush1.msra.mxu0 %v2616_v24 }
  0x36   : > { %861 = vmatprep.subr.mxu0 %v553_v36  ;;  %634 = vmatmul.mubr.f32.vlgmr.msra.gmra.mrb[2].mxu1 %v2585_v8 }
  0x37   : > { %639 = vmatprep.mubr.f32.mxu1 %v2462_v2 }
  0x38   : > { %733 = vmatmul.mubr.f32.gmra.mrb[2].mxu0 %v2599_v14 }
  0x39   : > { %738 = vmatprep.mubr.f32.mxu0 %v2462_v2 }
  0x3a   : > { %641 = vmatmul.mubr.f32.gmra.mrb[4].mxu1 %v2607_v16 }
  0x3b   : > { %646 = vmatprep.mubr.f32.mxu1 %v2462_v2 }
  0x3c   : > { %741 = vmatmul.mubr.f32.gmra.mrb[4].mxu0 %v530_v27 }
  0x3d   : > { %746 = vmatprep.mubr.f32.mxu0 %v2462_v2 }
  0x3e   : > { %648 = vmatmul.mubr.f32.gmra.mrb[6].mxu1 %v2623_v28 }
  0x3f   : > { %1137 = vmatprep.mubr.f32.mxu1 %v2462_v2 }
  0x40   : > { %749 = vmatmul.mubr.f32.gmra.mrb[6].mxu0 %v541_v38 }
  0x41   : > { %821 = vmatprep.mubr.f32.mxu0 %v2462_v2 }
  0x44   : > { %825 = vmatmul.mubr.f32.vlgmr.msra.gmra.mrb[0].mxu0 %v509_v20 }
  0x45   : > { %830 = vmatprep.mubr.f32.mxu0 %v2462_v2  ;;  %865 = vmatpush1.msra.mxu0 %v559_v34 }
  0x46   : > { %958 = vmatprep.subr.mxu0 %v440_v29 }
  0x48   : > { %834 = vmatmul.mubr.f32.gmra.mrb[2].mxu0 %v520_v21 }
  0x49   : > { %839 = vmatprep.mubr.f32.mxu0 %v2462_v2 }
  0x4c   : > { %843 = vmatmul.mubr.f32.gmra.mrb[4].mxu0 %v531_v35 }
  0x4d   : > { %848 = vmatprep.mubr.f32.mxu0 %v2462_v2 }
  0x50   : > { %852 = vmatmul.mubr.f32.gmra.mrb[6].mxu0 %v542_v41 }
  0x51   : > { %928 = vmatprep.mubr.f32.mxu0 %v2462_v2 }
  0x54   : > { %930 = vmatmul.mubr.f32.vlgmr.msra.gmra.mrb[0].mxu0 %v2583_v7 }
  0x55   : > { %935 = vmatprep.mubr.f32.mxu0 %v2462_v2  ;;  %960 = vmatpush1.msra.mxu0 %v2616_v24 }
  0x58   : > { %937 = vmatmul.mubr.f32.gmra.mrb[2].mxu0 %v2585_v8 }
  0x59   : > { %942 = vmatprep.mubr.f32.mxu0 %v2462_v2 }
  0x5c   : > { %944 = vmatmul.mubr.f32.gmra.mrb[4].mxu0 %v2607_v16 }
  0x5d   : > { %949 = vmatprep.mubr.f32.mxu0 %v2462_v2 }
  0x60   : > { %951 = vmatmul.mubr.f32.gmra.mrb[6].mxu0 %v2623_v28 }
  0x61   : > { %1023 = vmatprep.mubr.f32.mxu0 %v2462_v2 }
  0x64   : > { %1025 = vmatmul.mubr.f32.vlgmr.msra.gmra.mrb[0].mxu0 %v2583_v7 }
  0x65   : > { %1030 = vmatprep.mubr.f32.mxu0 %v2462_v2 }
  0x68   : > { %1032 = vmatmul.mubr.f32.gmra.mrb[2].mxu0 %v2585_v8 }
  0x69   : > { %1037 = vmatprep.mubr.f32.mxu0 %v2462_v2 }
  0x6c   : > { %1039 = vmatmul.mubr.f32.gmra.mrb[4].mxu0 %v2607_v16 }
  0x6d   : > { %1044 = vmatprep.mubr.f32.mxu0 %v2462_v2 }
  0x70   : > { %1046 = vmatmul.mubr.f32.gmra.mrb[6].mxu0 %v2623_v28 }
  0x92   : > { %v403_v58 = vpop.permute.xlu0 %402  ;;  %v413_v61 = vpop.permute.xlu1 %412 }
  0x96   : > { %v408_v63 = vpop.permute.xlu0 %407  ;;  %v418_v15 = vpop.permute.xlu1 %417 }
  0xf7   : > { %v513_v48 = vpop.f32.mrb[0].mxu1 }
  0xf8   : > { %v515_v49 = vpop.f32.mrb[1].mxu1  ;;  %v514_v60 = vadd.f32 %v513_v48, %v403_v58 }
  0xf9   : > { %v516_v62 = vadd.f32 %v515_v49, %v403_v58 }
 0x109   : > { %v635_v50 = vpop.f32.mrb[2].mxu1 }
 0x10a   : > { %v637_v51 = vpop.f32.mrb[3].mxu1  ;;  %v2196_v6 = vadd.f32 %v635_v50, %v408_v63 }
 0x10b   : > { %v2198_v8 = vadd.f32 %v637_v51, %v408_v63 }
 0x10d   : > { %v642_v52 = vpop.f32.mrb[4].mxu1 }
 0x10e   : > { %v644_v53 = vpop.f32.mrb[5].mxu1  ;;  %v2200_v18 = vadd.f32 %v642_v52, %v413_v61 }
 0x10f   : > { %v2202_v21 = vadd.f32 %v644_v53, %v413_v61 }
 0x111   : > { %v649_v54 = vpop.f32.mrb[6].mxu1 }
 0x112   : > { %v651_v55 = vpop.f32.mrb[7].mxu1  ;;  %v2204_v26 = vadd.f32 %v649_v54, %v418_v15 }
 0x113   : > { %v2206_v31 = vadd.f32 %v651_v55, %v418_v15 }
 0x137   : > { %v1026_v0 = vpop.f32.mrb[0].mxu0 }
 0x138   : > { %v2193_v3 = vadd.f32 %v1026_v0, %v514_v60  ;;  %v1028_v4 = vpop.f32.mrb[1].mxu0 }
 0x139   : > { %v2195_v5 = vadd.f32 %v1028_v4, %v516_v62 }
 0x13a   : > { %v1052_v7 = vmax.f32 %v2193_v3, 0.0 }
 0x13b   : > { %v1053_v9 = vmax.f32 %v2195_v5, 0.0  ;;  %v1033_v10 = vpop.f32.mrb[2].mxu0 }
 0x13c   : > { %v1067_v12 = vand.u32 4294901760, %v1052_v7  ;;  %v2197_v13 = vadd.f32 %v2196_v6, %v1033_v10  ;;  %v1035_v14 = vpop.f32.mrb[3].mxu0 }
 0x13d   : > { %v1065_v16 = vand.u32 4294901760, %v1053_v9  ;;  %v2199_v17 = vadd.f32 %v2198_v8, %v1035_v14 }
 0x13e   : > { %v2683_v19 = vsub.f32 %v1052_v7, %v1067_v12  ;;  %v1054_v20 = vmax.f32 %v2197_v13, 0.0 }
 0x13f   : > { %v2685_v22 = vsub.f32 %v1053_v9, %v1065_v16  ;;  %v1055_v23 = vmax.f32 %v2199_v17, 0.0  ;;  %v1040_v24 = vpop.f32.mrb[4].mxu0 }
 0x140   : > { %v1157_v27 = vand.u32 4294901760, %v2683_v19  ;;  %v1071_v28 = vand.u32 4294901760, %v1054_v20  ;;  %v2201_v29 = vadd.f32 %v2200_v18, %v1040_v24  ;;  %v1042_v30 = vpop.f32.mrb[5].mxu0 }
 0x141   : > { %v1151_v32 = vand.u32 4294901760, %v2685_v22  ;;  %v1069_v33 = vand.u32 4294901760, %v1055_v23  ;;  %v2203_v34 = vadd.f32 %v2202_v21, %v1042_v30 }
 0x142   : > { %v1158_v35 = vsub.f32 %v2683_v19, %v1157_v27  ;;  %v2695_v36 = vpack.c.bf16 %v1071_v28, %v1067_v12  ;;  %v2697_v37 = vsub.f32 %v1054_v20, %v1071_v28  ;;  %v1056_v38 = vmax.f32 %v2201_v29, 0.0 }
 0x143   : > { %v2699_v39 = vsub.f32 %v1055_v23, %v1069_v33  ;;  %v1057_v40 = vmax.f32 %v2203_v34, 0.0  ;;  %v1047_v41 = vpop.f32.mrb[6].mxu0  ;;  %v2701_v42 = vpack.c.bf16 %v1069_v33, %v1065_v16  ;;  %v1152_v43 = vsub.f32 %v2685_v22, %v1151_v32 }
 0x144   : > { %v1159_v44 = vand.u32 4294901760, %v1158_v35  ;;  %v1169_v45 = vand.u32 4294901760, %v2697_v37  ;;  %v1075_v46 = vand.u32 4294901760, %v1056_v38  ;;  %v2205_v47 = vadd.f32 %v2204_v26, %v1047_v41  ;;  %v1049_v48 = vpop.f32.mrb[7].mxu0 }
 0x145   : > { %v1163_v49 = vand.u32 4294901760, %v2699_v39  ;;  %v1073_v50 = vand.u32 4294901760, %v1057_v40  ;;  %v2207_v51 = vadd.f32 %v2206_v31, %v1049_v48  ;;  %2143 = vmatprep.subr.bf16.mxu1 %v2701_v42  ;;  %v1153_v52 = vand.u32 4294901760, %v1152_v43  ;;  %v1657_v43 = vld [vmem:[%s378_s16 + $0x8] sm:$0xff]  ;;  %v2752_v48 = vld [vmem:[%s378_s16 + $0x30] sm:$0x11] }
 0x146   : > { %v1170_v53 = vsub.f32 %v2697_v37, %v1169_v45  ;;  %v1180_v54 = vsub.f32 %v1056_v38, %v1075_v46  ;;  %v1058_v55 = vmax.f32 %v2205_v47, 0.0  ;;  %2145 = vmatpush1.bf16.msra.mxu1 %v2695_v36  ;;  %v2158_v56 = vpack.c.bf16 %v2699_v39, %v2685_v22  ;;  %v2747_v47 = vld [vmem:[%s378_s16 + $0x28] sm:$0xff] }
 0x147   : > { %v1174_v57 = vsub.f32 %v1057_v40, %v1073_v50  ;;  %v1059_v58 = vmax.f32 %v2207_v51, 0.0  ;;  %v1164_v60 = vsub.f32 %v2699_v39, %v1163_v49  ;;  %v2160_v61 = vpack.c.bf16 %v2697_v37, %v2683_v19 }
 0x148   : > { %v1171_v62 = vand.u32 4294901760, %v1170_v53  ;;  %v1181_v63 = vand.u32 4294901760, %v1180_v54  ;;  %v1079_v0 = vand.u32 4294901760, %v1058_v55  ;;  %v2174_v3 = vpack.c.bf16 %v1163_v49, %v1151_v32 }
 0x149   : > { %v1175_v4 = vand.u32 4294901760, %v1174_v57  ;;  %v1077_v5 = vand.u32 4294901760, %v1059_v58  ;;  %v1165_v6 = vand.u32 4294901760, %v1164_v60  ;;  %v2176_v7 = vpack.c.bf16 %v1169_v45, %v1157_v27  ;;  %v2743_v45 = vld [vmem:[%s378_s16 + $0x18] sm:$0xff]  ;;  %v1614_v60 = vld [vmem:[%s387_s20] sm:$0x3] }
 0x14a   : > { %v2148_v8 = vpack.c.bf16 %v1079_v0, %v1075_v46  ;;  %v1192_v9 = vsub.f32 %v1058_v55, %v1079_v0  ;;  %v2152_v10 = vpack.c.bf16 %v1171_v62, %v1159_v44  ;;  %v1182_v15 = vsub.f32 %v1180_v54, %v1181_v63  ;;  %v1734_v44 = vld [vmem:[%s378_s16 + $0x10] sm:$0xff]  ;;  %v2745_v46 = vld [vmem:[%s378_s16 + $0x20] sm:$0xff]  ;;  %s2356_s20 = scalar_lea.vmem %s2355_s19, 64 }
 0x14b   : > { %v1186_v12 = vsub.f32 %v1059_v58, %v1077_v5  ;;  %v2146_v13 = vpack.c.bf16 %v1077_v5, %v1073_v50  ;;  %v2150_v14 = vpack.c.bf16 %v1165_v6, %v1153_v52  ;;  %v1142_v19 = vand.u32 4294901760, %v2690_v25  ;;  %p2358_p2 = scmp.lt.s32.totalorder %s2356_s20, %s2350_s17 }
 0x14c   : > { %v1193_v16 = vand.u32 4294901760, %v1192_v9  ;;  %v2164_v17 = vpack.c.bf16 %v1192_v9, %v1180_v54  ;;  %v1176_v20 = vsub.f32 %v1174_v57, %v1175_v4  ;;  %v1183_v27 = vand.u32 4294901760, %v1182_v15 }
 0x14d   : > { %v1187_v18 = vand.u32 4294901760, %v1186_v12  ;;  %2147 = vmatprep.subr.bf16.mxu1 %v2146_v13  ;;  %v2162_v21 = vpack.c.bf16 %v1186_v12, %v1174_v57  ;;  %v2464_v37 = vmov 1983009808   ;;  %v2465_v40 = vmov 1966171168   ;;  %p2359_p3 = por %p2358_p2, %p2357_p1 }
 0x14e   : > { %v1194_v22 = vsub.f32 %v1192_v9, %v1193_v16  ;;  %2149 = vmatpush1.bf16.msra.mxu1 %v2148_v8  ;;  %v2180_v23 = vpack.c.bf16 %v1193_v16, %v1181_v63  ;;  %v1177_v29 = vand.u32 4294901760, %v1176_v20  ;;  %v1620_v38 = vunpack.c.l.s4 %v2464_v37 }
 0x14f   : > { %2151 = vmatprep.subr.bf16.mxu1 %v2150_v14  ;;  %v1188_v24 = vsub.f32 %v1186_v12, %v1187_v18  ;;  %v2178_v26 = vpack.c.bf16 %v1187_v18, %v1175_v4  ;;  %v1644_v41 = vunpack.c.l.s4 %v2465_v40  ;;  %v1660_v52 = vunpack.c.l.bf16 %v1657_v43  ;;  %p2360_p5 = pnand %p2359_p3, %p2353_p0 }
 0x150   : > { %v1195_v28 = vand.u32 4294901760, %v1194_v22  ;;  %v1621_v39 = vunpack.c.0.s8 %v1620_v38  ;;  %v1736_v55 = vunpack.c.l.bf16 %v1734_v44  ;;  %v1798_v57 = vunpack.c.l.bf16 %v2745_v46 }
 0x151   : > { %1143 = vmatmul.mubr.f32.vlgmr.msra.gmra.mrb[8].mxu1 %v1142_v19  ;;  %v1189_v30 = vand.u32 4294901760, %v1188_v24  ;;  %v1645_v54 = vunpack.c.0.s8 %v1644_v41  ;;  %v1800_v58 = vunpack.c.l.bf16 %v2747_v47  ;;  %v1859_v62 = vunpack.c.l.bf16 %v2752_v48 }
 0x152   : > { %2153 = vmatpush1.bf16.msra.mxu1 %v2152_v10  ;;  %v2156_v31 = vpack.c.bf16 %v1195_v28, %v1183_v27  ;;  %1253 = vmatprep.mubr.f32.mxu1 %v2462_v2  ;;  %v1661_v0 = vunpack.c.h.bf16 %v1657_v43  ;;  %v1739_v6 = vunpack.c.h.bf16 %v2743_v45  ;;  %v1615_v10 = vunpack.c.l.bf16 %v1614_v60 }
 0x153   : > { %v2154_v32 = vpack.c.bf16 %v1189_v30, %v1177_v29 }
 0x155   : > { %2155 = vmatprep.subr.bf16.mxu1 %v2154_v32 }
 0x156   : > { %2157 = vmatpush1.bf16.msra.mxu1 %v2156_v31 }
 0x157   : > { %2159 = vmatprep.subr.bf16.mxu1 %v2158_v56  ;;  %v1738_v56 = vunpack.c.l.bf16 %v2743_v45 }
 0x159   : > { %1255 = vmatmul.mubr.f32.vlgmr.msra.gmra.mrb[8].mxu1 %v2677_v59 }
 0x15a   : > { %2161 = vmatpush1.bf16.msra.mxu1 %v2160_v61  ;;  %1341 = vmatprep.mubr.f32.mxu1 %v2462_v2 }
 0x15b   : > { %2163 = vmatprep.subr.bf16.mxu1 %v2162_v21 }
 0x15e   : > { %2165 = vmatpush1.bf16.msra.mxu1 %v2164_v17 }
 0x15f   : > { %2167 = vmatprep.subr.bf16.mxu1 %v2701_v42 }
 0x161   : > { %1344 = vmatmul.mubr.f32.vlgmr.msra.gmra.mrb[8].mxu1 %v2680_v1 }
 0x162   : > { %2169 = vmatpush1.bf16.msra.mxu1 %v2695_v36  ;;  %1422 = vmatprep.mubr.f32.mxu1 %v2462_v2 }
 0x163   : > { %2171 = vmatprep.subr.bf16.mxu1 %v2146_v13 }
 0x166   : > { %2173 = vmatpush1.bf16.msra.mxu1 %v2148_v8 }
 0x167   : > { %2175 = vmatprep.subr.bf16.mxu1 %v2174_v3  ;;  %v1737_v3 = vunpack.c.h.bf16 %v1734_v44 }
 0x169   : > { %1426 = vmatmul.mubr.f32.vlgmr.msra.gmra.mrb[8].mxu1 %v1140_v11 }
 0x16a   : > { %2177 = vmatpush1.bf16.msra.mxu1 %v2176_v7  ;;  %1520 = vmatprep.mubr.f32.mxu1 %v2462_v2  ;;  %v1799_v7 = vunpack.c.h.bf16 %v2745_v46 }
 0x16b   : > { %2179 = vmatprep.subr.bf16.mxu1 %v2178_v26 }
 0x16e   : > { %2181 = vmatpush1.bf16.msra.mxu1 %v2180_v23 }
 0x16f   : > { %2183 = vmatprep.subr.bf16.mxu1 %v2701_v42  ;;  %v1656_v42 = vld [vmem:[%s378_s16] sm:$0xff]  ;;  %s1943_s16 = scalar_lea.sflag [#allocation5], %s2767_s23 }
 0x170   : > { %v1658_v51 = vunpack.c.l.bf16 %v1656_v42  ;;  %v1659_v63 = vunpack.c.h.bf16 %v1656_v42 }
 0x171   : > { %1522 = vmatmul.mubr.f32.vlgmr.msra.gmra.mrb[8].mxu1 %v2677_v59 }
 0x172   : > { %2185 = vmatpush1.bf16.msra.mxu1 %v2695_v36  ;;  %1600 = vmatprep.mubr.f32.mxu1 %v2462_v2  ;;  %v1622_v36 = vlaneseq }
 0x173   : > { %2187 = vmatprep.subr.bf16.mxu1 %v2146_v13 }
 0x174   : > { %vm2769_vm3 = vcmp.lt.s32.totalorder %v1622_v36, 256 }
 0x176   : > { %2189 = vmatpush1.bf16.msra.mxu1 %v2148_v8  ;;  %v1801_v8 = vunpack.c.h.bf16 %v2747_v47 }
 0x179   : > { %1602 = vmatmul.mubr.f32.vlgmr.msra.gmra.mrb[8].mxu1 %v2677_v59  ;;  %v1623_v59 = vshrl.u32 %v1622_v36, 7 }
 0x17b   : > { %v1664_v49 = vsub.s32 1, %v1623_v59  ;;  %v1676_v50 = vsub.s32 0, %v1623_v59  ;;  %v1624_v53 = vsub.s32 %v1621_v39, %v1623_v59  ;;  %v2764_v13 = vsub.s32 %v1645_v54, %v1623_v59 }
 0x24c   : > { %v2730_v1 = vpop.f32.mrb[8].mxu1 }
 0x24d   : > { %v1608_v11 = vmul.f32 0.5, %v2730_v1  ;;  %v2733_v25 = vpop.f32.mrb[9].mxu1  ;;  %v2762_v9 = vrot.slane %v2730_v1, %v1676_v50 }
 0x24e   : > { %v1609_v33 = vmul.f32 0.5, %v2733_v25  ;;  %v1632_v34 = vcombine.low %v2730_v1, %v2733_v25  ;;  %v2783_v31 = vrot.slane %v2733_v25, %v1676_v50 }
 0x24f   : > { %v1610_v35 = vmul.f32 1.442695, %v1608_v11 }
 0x250   : > { %v1612_v2 = vmul.f32 1.442695, %v1609_v33 }
 0x251   : > { %2318 = vpow2.f32 %v1610_v35  ;;  %v1639_v35 = vrot.slane %v1632_v34, %v1624_v53 }
 0x252   : > { %2320 = vpow2.f32 %v1612_v2 }
 0x25b   : > { %v2319_v61 = vpop.eup %2318 }
 0x25c   : > { %v2321_v4 = vpop.eup %2320  ;;  %v1665_v5 = vrot.slane %v2319_v61, %v1664_v49 }
 0x25d   : > { %v1618_v12 = vcombine.low %v2319_v61, %v2321_v4  ;;  %v2773_v22 = vrot.slane %v2321_v4, %v1664_v49 }
 0x25e   : > { %v1670_v14 = vmul.f32 %v1665_v5, %v1658_v51  ;;  %v1672_v15 = vmul.f32 %v1665_v5, %v1660_v52  ;;  %v1740_v16 = vmul.f32 %v1736_v55, %v1665_v5  ;;  %v1742_v17 = vmul.f32 %v1738_v56, %v1665_v5 }
 0x25f   : > { %v1802_v19 = vmul.f32 %v1798_v57, %v1665_v5  ;;  %v1804_v20 = vmul.f32 %v1800_v58, %v1665_v5  ;;  %v1625_v21 = vrot.slane %v1618_v12, %v1624_v53  ;;  %v1671_v59 = vmul.f32 %v2773_v22, %v1659_v63 }
 0x260   : > { %v1682_v23 = vadd.f32 %v2762_v9, %v1670_v14  ;;  %v1684_v24 = vadd.f32 %v2762_v9, %v1672_v15  ;;  %v1744_v26 = vadd.f32 %v1740_v16, %v2762_v9  ;;  %v1746_v27 = vadd.f32 %v1742_v17, %v2762_v9 }
 0x261   : > { %v1806_v28 = vadd.f32 %v1802_v19, %v2762_v9  ;;  %v1808_v29 = vadd.f32 %v1804_v20, %v2762_v9  ;;  %v2130_v30 = vrot.slane %v1625_v21, 9  ;;  %v1673_v39 = vmul.f32 %v2773_v22, %v1661_v0 }
 0x262   : > { %v1686_v32 = vmul.f32 0.5, %v1682_v23  ;;  %v1688_v11 = vmul.f32 0.5, %v1684_v24  ;;  %v1748_v33 = vmul.f32 0.5, %v1744_v26  ;;  %v1750_v36 = vmul.f32 0.5, %v1746_v27 }
 0x263   : > { %v1810_v2 = vmul.f32 0.5, %v1806_v28  ;;  %v1812_v37 = vmul.f32 0.5, %v1808_v29  ;;  %v1629_v38 = vmul.f32 %v2130_v30, %v1615_v10  ;;  %v1741_v40 = vmul.f32 %v1737_v3, %v2773_v22 }
 0x264   : > { %2322 = vtanh.f32 %v1686_v32  ;;  %v1743_v1 = vmul.f32 %v1739_v6, %v2773_v22  ;;  %v1803_v25 = vmul.f32 %v1799_v7, %v2773_v22  ;;  %v1683_v34 = vadd.f32 %v2783_v31, %v1671_v59 }
 0x265   : > { %2324 = vtanh.f32 %v1688_v11  ;;  %v1641_v41 = vadd.f32 %v1639_v35, %v1629_v38  ;;  %v1685_v42 = vadd.f32 %v2783_v31, %v1673_v39  ;;  %v1745_v43 = vadd.f32 %v1741_v40, %v2783_v31 }
 0x266   : > { %2326 = vtanh.f32 %v1748_v33  ;;  %v1747_v45 = vadd.f32 %v1743_v1, %v2783_v31  ;;  %v1805_v46 = vmul.f32 %v1801_v8, %v2773_v22  ;;  %v1861_v47 = vmul.f32 %v1859_v62, %v1665_v5 }
 0x267   : > { %2328 = vtanh.f32 %v1750_v36  ;;  %v1649_v44 = vrot.slane %v1641_v41, %v2764_v13  ;;  %v1687_v49 = vmul.f32 0.5, %v1683_v34  ;;  %v1689_v50 = vmul.f32 0.5, %v1685_v42 }
 0x268   : > { %v1860_v51 = vunpack.c.h.bf16 %v2752_v48  ;;  %2330 = vtanh.f32 %v1810_v2  ;;  %v1749_v52 = vmul.f32 0.5, %v1745_v43  ;;  %v1807_v53 = vadd.f32 %v1803_v25, %v2783_v31 }
 0x269   : > { %v1809_v54 = vadd.f32 %v1805_v46, %v2783_v31  ;;  %1655 = vst.msk [vmem:[%s359_s30] sm:$0x3] %vm2769_vm3, %v1649_v44  ;;  %2332 = vtanh.f32 %v1812_v37  ;;  %v1751_v55 = vmul.f32 0.5, %v1747_v45 }
 0x26a   : > { %2363 = shalt.err (!%p2360_p5)
}
 0x26b   : > { %s2364_s30 = scalar_lea.hbm %s2807_s15, 32  ;;  %s2368_s18 = scalar_lea.hbm %s2911_s7, 64 }
 0x26c   : > { %p2365_p6 = scmp.ne.s32.totalorder %s2807_s15, %s2364_s30  ;;  %p2369_p10 = scmp.lt.u32.totalorder %s2807_s15, %s2911_s7 }
 0x26d   : > { %p2370_p11 = scmp.lt.u32.totalorder %s2368_s18, %s2364_s30  ;;  %p2372_p13 = scmp.lt.u32.totalorder %s2364_s30, %s2807_s15 }
 0x26e   : > { %p2366_p7 = pnand %p2365_p6, %p2548_p4 }
 0x26f   : > { %p2371_p12 = por %p2370_p11, %p2369_p10 }
 0x270   : > { %p2367_p9 = pneg %p2366_p7 }
 0x271   : > { %p2373_p0 = por %p2372_p13, %p2371_p12 }
 0x273   : > { %p2374_p1 = pnand %p2373_p0, %p2367_p9 }
 0x275   : > { %2377 = shalt.err (!%p2374_p1)
}
 0x276   : > { %2252 = dma.vmem_to_hbm [thread:$0]  (%p2548_p4), %s2809_s8, 32, %s2807_s15, %s1943_s16   ;;  %2334 = vtanh.f32 %v1687_v49  ;;  %v1863_v48 = vadd.f32 %v1861_v47, %v2762_v9  ;;  %v1811_v56 = vmul.f32 0.5, %v1807_v53  ;;  %v1813_v57 = vmul.f32 0.5, %v1809_v54  ;;  %v2323_v60 = vpop.eup %2322 }
 0x277   : > { %2336 = vtanh.f32 %v1689_v50  ;;  %v1862_v58 = vmul.f32 %v1860_v51, %v2773_v22  ;;  %v2325_v61 = vpop.eup %2324  ;;  %v1694_v62 = vmul.f32 0.5, %v2323_v60  ;;  %vm1871_vm4 = vcmask 1041408   ;;  %s352_s22 = scalar_lea.vmem [#allocation2], %s2124_s21  ;;  %s2917_s15 = sshll.u32 %s2452_s27, 5 }
 0x278   : > { %2338 = vtanh.f32 %v1749_v52  ;;  %v2327_v63 = vpop.eup %2326  ;;  %v1696_v0 = vmul.f32 0.5, %v2325_v61  ;;  %v1865_v3 = vmul.f32 0.5, %v1863_v48  ;;  %s1959_s8 = sshll.u32 %s352_s22, 4  ;;  %s2854_s20 = scalar_lea.hbm %s2910_s6, %s2917_s15  ;;  %s2856_s8 = int_to_ptr.vmem [resolvable:$true] %s1959_s8 }
 0x279   : > { %2340 = vtanh.f32 %v1751_v55  ;;  %v2329_v4 = vpop.eup %2328  ;;  %v1756_v5 = vmul.f32 0.5, %v2327_v63  ;;  %v1864_v6 = vadd.f32 %v1862_v58, %v2783_v31  ;;  %v1714_v7 = vmul.f32 %v1694_v62, %v1694_v62  ;;  %s1938_s21 = scalar_lea.sflag [#allocation3], %s2767_s23  ;;  %s2378_s30 = scalar_lea.vmem %s2856_s8, 32 }
 0x27a   : > { %2342 = vtanh.f32 %v1811_v56  ;;  %v1758_v8 = vmul.f32 0.5, %v2329_v4  ;;  %v1698_v9 = vadd.f32 %v1696_v0, %v1694_v62  ;;  %v1716_v10 = vmul.f32 %v1696_v0, %v1696_v0  ;;  %v2331_v12 = vpop.eup %2330  ;;  %p2379_p2 = scmp.ne.s32.totalorder %s2856_s8, %s2378_s30  ;;  %s2467_s27 = smov [#allocation2]  }
 0x27b   : > { %2344 = vtanh.f32 %v1813_v57  ;;  %v1776_v14 = vmul.f32 %v1756_v5, %v1756_v5  ;;  %v2333_v15 = vpop.eup %2332  ;;  %v1866_v22 = vmul.f32 0.5, %v1864_v6  ;;  %v1818_v32 = vmul.f32 0.5, %v2331_v12  ;;  %s2382_s10 = sshll.u32 %s2467_s27, 4  ;;  %s2383_s10 = int_to_ptr.vmem [resolvable:$false] %s2382_s10 }
 0x27c   : > { %v1699_v16 = vrot.slane %v1698_v9, 4  ;;  %v1718_v17 = vadd.f32 %v1716_v10, %v1714_v7  ;;  %v1760_v19 = vadd.f32 %v1758_v8, %v1756_v5  ;;  %v1778_v20 = vmul.f32 %v1758_v8, %v1758_v8  ;;  %p2380_p3 = pnand %p2379_p2, %p2548_p4  ;;  %s2384_s12 = scalar_lea.vmem %s2383_s10, 64 }
 0x27d   : > { %2346 = vtanh.f32 %v1865_v3  ;;  %v1820_v11 = vmul.f32 0.5, %v2333_v15  ;;  %v1838_v15 = vmul.f32 %v1818_v32, %v1818_v32  ;;  %p2385_p6 = scmp.lt.s32.totalorder %s2856_s8, %s2383_s10  ;;  %p2386_p7 = scmp.lt.s32.totalorder %s2384_s12, %s2378_s30 }
 0x27e   : > { %v1700_v26 = vadd.f32 %v1699_v16, %v1698_v9  ;;  %v1719_v27 = vrot.slane %v1718_v17, 4  ;;  %v1761_v28 = vrot.slane %v1760_v19, 4  ;;  %v1780_v31 = vadd.f32 %v1778_v20, %v1776_v14  ;;  %p2381_p5 = pneg %p2380_p3 }
 0x27f   : > { %2348 = vtanh.f32 %v1866_v22  ;;  %v1822_v49 = vadd.f32 %v1820_v11, %v1818_v32  ;;  %v1840_v16 = vmul.f32 %v1820_v11, %v1820_v11  ;;  %p2387_p9 = por %p2386_p7, %p2385_p6 }
 0x280   : > { %v2335_v21 = vpop.eup %2334  ;;  %v1701_v36 = vrot.slane %v1700_v26, 2  ;;  %v1720_v37 = vadd.f32 %v1719_v27, %v1718_v17  ;;  %v1762_v40 = vadd.f32 %v1761_v28, %v1760_v19  ;;  %v1781_v53 = vrot.slane %v1780_v31, 4 }
 0x281   : > { %v2337_v23 = vpop.eup %2336  ;;  %v1695_v24 = vmul.f32 0.5, %v2335_v21  ;;  %v1823_v3 = vrot.slane %v1822_v49, 4  ;;  %p2388_p10 = pnand %p2387_p9, %p2381_p5 }
 0x282   : > { %v2339_v29 = vpop.eup %2338  ;;  %v1697_v30 = vmul.f32 0.5, %v2337_v23  ;;  %v1721_v42 = vrot.slane %v1720_v37, 2  ;;  %v1763_v44 = vrot.slane %v1762_v40, 2  ;;  %v1702_v45 = vadd.f32 %v1701_v36, %v1700_v26 }
 0x283   : > { %v2341_v33 = vpop.eup %2340  ;;  %v1757_v35 = vmul.f32 0.5, %v2339_v29  ;;  %v1715_v2 = vmul.f32 %v1695_v24, %v1695_v24  ;;  %v1782_v63 = vadd.f32 %v1781_v53, %v1780_v31  ;;  %v1824_v10 = vadd.f32 %v1823_v3, %v1822_v49 }
 0x284   : > { %v1759_v38 = vmul.f32 0.5, %v2341_v33  ;;  %v1705_v59 = vadd.f32 %v1697_v30, %v1695_v24  ;;  %v1717_v39 = vmul.f32 %v1697_v30, %v1697_v30  ;;  %v2343_v41 = vpop.eup %2342  ;;  %v1764_v52 = vadd.f32 %v1763_v44, %v1762_v40 }
 0x285   : > { %v1777_v1 = vmul.f32 %v1757_v35, %v1757_v35  ;;  %v2345_v25 = vpop.eup %2344  ;;  %v1819_v54 = vmul.f32 0.5, %v2343_v41  ;;  %v1722_v60 = vadd.f32 %v1721_v42, %v1720_v37  ;;  %v1703_v4 = vrot.slane %v1702_v45, 1 }
 0x286   : > { %v1706_v34 = vrot.slane %v1705_v59, 4  ;;  %v1725_v43 = vadd.f32 %v1717_v39, %v1715_v2  ;;  %v1767_v46 = vadd.f32 %v1759_v38, %v1757_v35  ;;  %v1779_v47 = vmul.f32 %v1759_v38, %v1759_v38 }
 0x287   : > { %v1821_v55 = vmul.f32 0.5, %v2345_v25  ;;  %v2347_v57 = vpop.eup %2346  ;;  %v1765_v7 = vrot.slane %v1764_v52, 1  ;;  %v1723_v14 = vrot.slane %v1722_v60, 1  ;;  %v1783_v21 = vrot.slane %v1782_v63, 2 }
 0x288   : > { %v1707_v50 = vadd.f32 %v1706_v34, %v1705_v59  ;;  %v1726_v51 = vrot.slane %v1725_v43, 4  ;;  %v1768_v48 = vrot.slane %v1767_v46, 4  ;;  %v1787_v56 = vadd.f32 %v1779_v47, %v1777_v1 }
 0x289   : > { %v1829_v12 = vadd.f32 %v1821_v55, %v1819_v54  ;;  %v2349_v17 = vpop.eup %2348  ;;  %v1704_v23 = vadd.f32 %v1703_v4, %v1702_v45  ;;  %v1766_v24 = vadd.f32 %v1765_v7, %v1764_v52  ;;  %v1839_v26 = vmul.f32 %v1819_v54, %v1819_v54 }
 0x28a   : > { %v1708_v58 = vrot.slane %v1707_v50, 2  ;;  %v1727_v61 = vadd.f32 %v1726_v51, %v1725_v43  ;;  %v1769_v62 = vadd.f32 %v1768_v48, %v1767_v46  ;;  %v1788_v0 = vrot.slane %v1787_v56, 4 }
 0x28b   : > { %v1830_v22 = vrot.slane %v1829_v12, 4  ;;  %v1825_v29 = vrot.slane %v1824_v10, 2  ;;  %v1724_v31 = vadd.f32 %v1723_v14, %v1722_v60  ;;  %v1841_v33 = vmul.f32 %v1821_v55, %v1821_v55 }
 0x28c   : > { %v1709_v5 = vadd.f32 %v1708_v58, %v1707_v50  ;;  %v1728_v6 = vrot.slane %v1727_v61, 2  ;;  %v1770_v8 = vrot.slane %v1769_v62, 2  ;;  %v1789_v9 = vadd.f32 %v1788_v0, %v1787_v56 }
 0x28d   : > { %v1831_v30 = vadd.f32 %v1830_v22, %v1829_v12  ;;  %v1842_v35 = vadd.f32 %v1840_v16, %v1838_v15  ;;  %v1869_v36 = vmul.f32 0.5, %v2347_v57  ;;  %v1784_v11 = vadd.f32 %v1783_v21, %v1782_v63 }
 0x28e   : > { %v1729_v19 = vadd.f32 %v1728_v6, %v1727_v61  ;;  %v1771_v20 = vadd.f32 %v1770_v8, %v1769_v62  ;;  %v1710_v27 = vrot.slane %v1709_v5, 1  ;;  %v1790_v28 = vrot.slane %v1789_v9, 2 }
 0x28f   : > { %v1832_v37 = vrot.slane %v1831_v30, 2  ;;  %v1774_v38 = vadd.f32 %v1766_v24, %v1704_v23  ;;  %v1843_v59 = vrot.slane %v1842_v35, 4  ;;  %v1849_v39 = vadd.f32 %v1841_v33, %v1839_v26 }
 0x290   : > { %v1730_v2 = vrot.slane %v1729_v19, 1  ;;  %v1772_v32 = vrot.slane %v1771_v20, 1  ;;  %v1870_v40 = vmul.f32 0.5, %v2349_v17  ;;  %v1711_v41 = vadd.f32 %v1710_v27, %v1709_v5 }
 0x291   : > { %v1791_v1 = vadd.f32 %v1790_v28, %v1789_v9  ;;  %v1826_v25 = vadd.f32 %v1825_v29, %v1824_v10  ;;  %v1833_v34 = vadd.f32 %v1832_v37, %v1831_v30  ;;  %v1844_v42 = vadd.f32 %v1843_v59, %v1842_v35 }
 0x292   : > { %v1850_v43 = vrot.slane %v1849_v39, 4  ;;  %v1872_v44 = vsel %vm1871_vm4, %v1869_v36, 0.0  ;;  %v1879_v45 = vsel %vm1871_vm4, %v1870_v40, 0.0  ;;  %v1731_v46 = vadd.f32 %v1730_v2, %v1729_v19 }
 0x293   : > { %v1773_v47 = vadd.f32 %v1772_v32, %v1771_v20  ;;  %v1785_v49 = vrot.slane %v1784_v11, 1  ;;  %v1873_v50 = vrot.slane %v1872_v44, 4  ;;  %v1845_v51 = vrot.slane %v1844_v42, 2 }
 0x294   : > { %v1851_v52 = vadd.f32 %v1850_v43, %v1849_v39  ;;  %v1880_v53 = vrot.slane %v1879_v45, 4  ;;  %v1888_v54 = vmul.f32 %v1869_v36, %v1869_v36  ;;  %v1792_v55 = vrot.slane %v1791_v1, 1 }
 0x295   : > { %v1827_v48 = vrot.slane %v1826_v25, 1  ;;  %v1874_v56 = vadd.f32 %v1873_v50, %v1872_v44  ;;  %v1889_v57 = vmul.f32 %v1870_v40, %v1870_v40  ;;  %v1834_v58 = vrot.slane %v1833_v34, 1 }
 0x296   : > { %v1852_v60 = vrot.slane %v1851_v52, 2  ;;  %v1881_v61 = vadd.f32 %v1880_v53, %v1879_v45  ;;  %v1890_v62 = vsel %vm1871_vm4, %v1888_v54, 0.0  ;;  %v1846_v63 = vadd.f32 %v1845_v51, %v1844_v42 }
 0x297   : > { %v1875_v0 = vrot.slane %v1874_v56, 2  ;;  %v1891_v3 = vrot.slane %v1890_v62, 4  ;;  %v1897_v4 = vsel %vm1871_vm4, %v1889_v57, 0.0  ;;  %v1775_v5 = vadd.f32 %v1773_v47, %v1711_v41 }
 0x298   : > { %v1853_v6 = vadd.f32 %v1852_v60, %v1851_v52  ;;  %v1882_v7 = vrot.slane %v1881_v61, 2  ;;  %v1898_v8 = vrot.slane %v1897_v4, 4  ;;  %v1786_v9 = vadd.f32 %v1785_v49, %v1784_v11 }
 0x299   : > { %v1828_v10 = vadd.f32 %v1827_v48, %v1826_v25  ;;  %v1876_v12 = vadd.f32 %v1875_v0, %v1874_v56  ;;  %v1892_v14 = vadd.f32 %v1891_v3, %v1890_v62  ;;  %v1793_v15 = vadd.f32 %v1792_v55, %v1791_v1 }
 0x29a   : > { %v1835_v16 = vadd.f32 %v1834_v58, %v1833_v34  ;;  %v1883_v17 = vadd.f32 %v1882_v7, %v1881_v61  ;;  %v1899_v19 = vadd.f32 %v1898_v8, %v1897_v4  ;;  %v1847_v21 = vrot.slane %v1846_v63, 1 }
 0x29b   : > { %v1836_v20 = vadd.f32 %v1828_v10, %v1774_v38  ;;  %v1877_v22 = vrot.slane %v1876_v12, 1  ;;  %v1893_v23 = vrot.slane %v1892_v14, 2  ;;  %v1854_v26 = vrot.slane %v1853_v6, 1 }
 0x29c   : > { %v1837_v24 = vadd.f32 %v1835_v16, %v1775_v5  ;;  %v1884_v27 = vrot.slane %v1883_v17, 1  ;;  %v1900_v28 = vrot.slane %v1899_v19, 2  ;;  %v1794_v29 = vadd.f32 %v1786_v9, %v1724_v31 }
 0x29d   : > { %v1878_v30 = vadd.f32 %v1877_v22, %v1876_v12  ;;  %v1894_v33 = vadd.f32 %v1893_v23, %v1892_v14  ;;  %v1795_v35 = vadd.f32 %v1793_v15, %v1731_v46  ;;  %v1848_v32 = vadd.f32 %v1847_v21, %v1846_v63 }
 0x29e   : > { %v1885_v36 = vadd.f32 %v1884_v27, %v1883_v17  ;;  %v1901_v2 = vadd.f32 %v1900_v28, %v1899_v19  ;;  %v1855_v59 = vadd.f32 %v1854_v26, %v1853_v6 }
 0x29f   : > { %v1886_v11 = vadd.f32 %v1878_v30, %v1836_v20  ;;  %v1895_v37 = vrot.slane %v1894_v33, 1  ;;  %v1856_v38 = vadd.f32 %v1848_v32, %v1794_v29 }
 0x2a0   : > { %v1887_v39 = vadd.f32 %v1885_v36, %v1837_v24  ;;  %v1902_v40 = vrot.slane %v1901_v2, 1  ;;  %v1857_v1 = vadd.f32 %v1855_v59, %v1795_v35 }
 0x2a1   : > { %v1906_v41 = vmul.f32 0.02, %v1886_v11  ;;  %v1896_v34 = vadd.f32 %v1895_v37, %v1894_v33 }
 0x2a2   : > { %v1907_v25 = vmul.f32 0.02, %v1887_v39  ;;  %v1903_v43 = vadd.f32 %v1902_v40, %v1901_v2 }
 0x2a3   : > { %v1908_v42 = vmul.f32 50.0, %v1906_v41  ;;  %v1904_v44 = vadd.f32 %v1896_v34, %v1856_v38 }
 0x2a4   : > { %v1909_v31 = vmul.f32 50.0, %v1907_v25  ;;  %v1905_v46 = vadd.f32 %v1903_v43, %v1857_v1 }
 0x2a5   : > { %v1910_v45 = vmul.f32 %v1908_v42, %v1906_v41 }
 0x2a6   : > { %v1911_v47 = vmul.f32 %v1909_v31, %v1907_v25 }
 0x2a7   : > { %v1912_v49 = vsub.f32 %v1904_v44, %v1910_v45 }
 0x2a8   : > { %v1913_v50 = vsub.f32 %v1905_v46, %v1911_v47 }
 0x2a9   : > { %v1914_v51 = vmul.f32 0.020408163, %v1912_v49 }
 0x2aa   : > { %v1915_v52 = vmul.f32 0.020408163, %v1913_v50 }
 0x2ab   : > { %v1916_v53 = vmax.f32 %v1914_v51, 0.0 }
 0x2ac   : > { %v1917_v54 = vmax.f32 %v1915_v52, 0.0 }
 0x2ae   : > { %v1920_v55 = vcombine.low %v1916_v53, %v1917_v54 }
 0x2b0   : > { %v1927_v48 = vrot.slane %v1920_v55, %v2764_v13 }
 0x2b2   : > { %v1934_v56 = vrot.slane %v1927_v48, %v2764_v13 }
 0x2b4   : > { %1936 = vst.msk [vmem:[%s352_s22] sm:$0x3] %vm2769_vm3, %v1934_v56 }
 0x2b5   : > { %2391 = shalt.err (!%p2388_p10)
}
 0x2b6   : > { %s2392_s23 = scalar_lea.hbm %s2854_s20, 32  ;;  %s2396_s22 = scalar_lea.hbm %s2910_s6, 64 }
 0x2b7   : > { %p2393_p11 = scmp.ne.s32.totalorder %s2854_s20, %s2392_s23  ;;  %p2397_p0 = scmp.lt.u32.totalorder %s2854_s20, %s2910_s6 }
 0x2b8   : > { %p2398_p1 = scmp.lt.u32.totalorder %s2396_s22, %s2392_s23  ;;  %p2400_p3 = scmp.lt.u32.totalorder %s2392_s23, %s2854_s20 }
 0x2b9   : > { %p2394_p12 = pnand %p2393_p11, %p2548_p4 }
 0x2ba   : > { %p2399_p2 = por %p2398_p1, %p2397_p0 }
 0x2bb   : > { %p2395_p13 = pneg %p2394_p12 }
 0x2bc   : > { %p2401_p5 = por %p2400_p3, %p2399_p2 }
 0x2be   : > { %p2402_p6 = pnand %p2401_p5, %p2395_p13 }
 0x2c0   : > { %2405 = shalt.err (!%p2402_p6)
}
 0x2c1   : > { %2251 = dma.vmem_to_hbm [thread:$0]  (%p2548_p4), %s2856_s8, 32, %s2854_s20, %s1938_s21  }
 0x2c2 PF: > { %p2262_p7 = scmp.ge.s32.totalorder %s2460_s29, 2  ;;  %s1987_s17 = sand.u32 1, %s2440_s24  }
 0x2c3   : > { %s1988_s30 = scalar_lea.sflag [#allocation3], %s1987_s17 }
 0x2c4   : > { %p2256_p9 = pnand %p2262_p7, %p2555_p8 }
 0x2c6   : > { %2431 = dma.done.wait (!%p2256_p9), %s1988_s30, 32  }
 0x2c7   : > { %2433 = vsyncadd (!%p2256_p9), %s1988_s30, 4294967264  ;;  %s1997_s27 = scalar_lea.sflag [#allocation5], %s1987_s17 }
 0x2c8   : > { %2435 = dma.done.wait (!%p2256_p9), %s1997_s27, 32  }
 0x2c9   : > { %2437 = vsyncadd (!%p2256_p9), %s1997_s27, 4294967264  ;;  %s24_s29 = sadd.s32 1, %s2460_s29   ;;  %s2918_s24 = smov %s2444_s25 }
 0x2ca   : > { %p21_p10 = scmp.ge.s32.totalorder %s24_s29, 4   ;;  %s2919_s25 = smov %s2448_s26 }
 0x2cb   : > { %s2920_s26 = smov %s2561_s14  ;;  %s2921_s27 = smov %s2456_s28 }
 0x2cc   : > { %s2922_s28 = smov %s2924_s9  ;;  %23 = sbr.rel (!%p21_p10) target bundleno = 6 (0x6), region = 102 }
 0x2d3   :  { %2002 = vsyncpa [#allocation3], 1 }
 0x2d4   :  { %2004 = vsyncpa [#allocation3 + $0x1], 1 }
 0x2d5   :  { %2005 = vsyncpa [#allocation5], 1 }
 0x2d6   :  { %2007 = vsyncpa [#allocation5 + $0x1], 1 }

</bundles_post_ra>
